<compile_context>
chip_gen: v5e
topology: v5e:2x2
jax: 0.10.0
libtpu: 0.0.40
codegen_flags: <defaults>
</compile_context>

<pallas_src>
import functools

import jax
import jax.numpy as jnp
from jax import lax
from jax.experimental import pallas as pl
from jax.experimental.pallas import tpu as pltpu  # noqa: F401  (kept for CompilerParams use at prod shapes)


# ---------------------------------------------------------------------------
# Fused MHA kernel: one grid step handles every batch and every head.
# ---------------------------------------------------------------------------
def _fused_mha_kernel(q_ref, k_ref, v_ref, w_ref, b_ref, o_ref, *,
                      num_heads, head_dim):
    # q_ref: [T, B, E] (time-major, as the PyTorch module provides)
    # k_ref, v_ref: [S, B, E]
    # w_ref: [4, E, E] = [Wq^T * scale, Wk^T, Wv^T, Wo^T]   (each E_in x E_out)
    # b_ref: [4, 1, E] = [bq * scale,   bk,    bv,    bo ]
    # o_ref: [T, B, E]
    H, D = num_heads, head_dim
    T, B, E = q_ref.shape
    S = k_ref.shape[0]

    xq = q_ref[...]
    xk = k_ref[...]
    xv = v_ref[...]
    wq, wk, wv, wo = w_ref[0], w_ref[1], w_ref[2], w_ref[3]
    bq, bk, bv, bo = b_ref[0], b_ref[1], b_ref[2], b_ref[3]

    # ---- full-width in-projections (lane width E, not D=8) and per-(b,h)
    #      scores, stacked along sublanes so softmax is done once -------------
    s_rows = []
    v_proj = []
    for b in range(B):                       # static unroll; B is small
        qb = jnp.dot(xq[:, b, :], wq, preferred_element_type=jnp.float32) + bq   # [T, E]
        kb = jnp.dot(xk[:, b, :], wk, preferred_element_type=jnp.float32) + bk   # [S, E]
        vb = jnp.dot(xv[:, b, :], wv, preferred_element_type=jnp.float32) + bv   # [S, E]
        v_proj.append(vb)
        for h in range(H):
            qh = qb[:, h * D:(h + 1) * D]    # [T, D]
            kh = kb[:, h * D:(h + 1) * D]    # [S, D]
            # q @ k^T without materializing a transpose
            s_rows.append(lax.dot_general(qh, kh, (((1,), (1,)), ((), ())),
                                          preferred_element_type=jnp.float32))   # [T, S]
    s = jnp.concatenate(s_rows, axis=0)      # [B*H*T, S]

    # ---- one numerically-stable softmax for every (batch, head) at once ----
    s = s - jnp.max(s, axis=-1, keepdims=True)
    p = jnp.exp(s)
    p = p * pl.reciprocal(jnp.sum(p, axis=-1, keepdims=True), approx=False)

    # ---- attention-weighted values + output projection ---------------------
    # concat_h(o_h) @ Wo^T == sum_h o_h @ Wo^T[hD:(h+1)D, :]  -> output stays
    # lane-dense (E wide) without any in-kernel lane concatenation.
    outs = []
    for b in range(B):
        acc = jnp.zeros((T, E), jnp.float32)
        for h in range(H):
            row0 = (b * H + h) * T
            ph = p[row0:row0 + T, :]                        # [T, S]
            vh = v_proj[b][:, h * D:(h + 1) * D]            # [S, D]
            oh = jnp.dot(ph, vh, preferred_element_type=jnp.float32)            # [T, D]
            acc = acc + jnp.dot(oh, wo[h * D:(h + 1) * D, :],
                                preferred_element_type=jnp.float32)             # [T, E]
        outs.append(acc + bo)
    o_ref[...] = jnp.stack(outs, axis=1).astype(o_ref.dtype)   # [T, B, E]


# ---------------------------------------------------------------------------
# Wrapper
# ---------------------------------------------------------------------------
def multihead_attention(query, key, value, params, num_heads):
    """Pallas implementation of MultiheadAttention.forward (no masks, no dropout).

    query: [T, B, E], key/value: [S, B, E] (time-major, like the PyTorch module).
    Returns [T, B, E].
    """
    T, B, E = query.shape
    S = key.shape[0]
    H = num_heads
    D = E // H
    scaling = float(D) ** (-0.5)

    # Host-side (tiny, one-time) weight packing: transpose to [E_in, E_out],
    # fold the q scaling into Wq / bq, and pack everything into two operands.
    w_all = jnp.stack([params["wq"].T * scaling,
                       params["wk"].T,
                       params["wv"].T,
                       params["wo"].T], axis=0)                      # [4, E, E]
    b_all = jnp.stack([params["bq"] * scaling,
                       params["bk"],
                       params["bv"],
                       params["bo"]], axis=0).reshape(4, 1, E)       # [4, 1, E]

    kernel = functools.partial(_fused_mha_kernel, num_heads=H, head_dim=D)

    return pl.pallas_call(
        kernel,
        out_shape=jax.ShapeDtypeStruct((T, B, E), query.dtype),
        grid=(1,),                                   # single step: all batches inside
        in_specs=[
            pl.BlockSpec((T, B, E), lambda i: (0, 0, 0)),   # query (time-major)
            pl.BlockSpec((S, B, E), lambda i: (0, 0, 0)),   # key
            pl.BlockSpec((S, B, E), lambda i: (0, 0, 0)),   # value
            pl.BlockSpec((4, E, E), lambda i: (0, 0, 0)),   # packed weights
            pl.BlockSpec((4, 1, E), lambda i: (0, 0, 0)),   # packed biases
        ],
        out_specs=pl.BlockSpec((T, B, E), lambda i: (0, 0, 0)),
    )(query, key, value, w_all, b_all)


# ---------------------------------------------------------------------------
# Pure-JAX reference (for correctness check)
# ---------------------------------------------------------------------------
def reference(query, key, value, params, num_heads):
    T, B, E = query.shape
    S = key.shape[0]
    D = E // num_heads
    scaling = float(D) ** (-0.5)
    q = (query @ params["wq"].T + params["bq"]) * scaling
    k = key @ params["wk"].T + params["bk"]
    v = value @ params["wv"].T + params["bv"]
    q = q.reshape(T, B, num_heads, D).transpose(1, 2, 0, 3)
    k = k.reshape(S, B, num_heads, D).transpose(1, 2, 0, 3)
    v = v.reshape(S, B, num_heads, D).transpose(1, 2, 0, 3)
    w = jax.nn.softmax(jnp.matmul(q, k.transpose(0, 1, 3, 2)), axis=-1)
    o = jnp.matmul(w, v).transpose(2, 0, 1, 3).reshape(T, B, E)
    return o @ params["wo"].T + params["bo"]


# ---------------------------------------------------------------------------
# Main
# ---------------------------------------------------------------------------
if __name__ == "__main__":
    embed_dim = 32
    num_heads = 4
    T, S, B = 8, 8, 2

    key_rng = jax.random.PRNGKey(0)
    keys = jax.random.split(key_rng, 12)

    def xavier(k, shape):
        fan_in, fan_out = shape[1], shape[0]
        limit = (6.0 / (fan_in + fan_out)) ** 0.5
        return jax.random.uniform(k, shape, jnp.float32, -limit, limit)

    # Conv2d(E, E, 1x1) weights == [E_out, E_in] matrices; biases [E].
    params = {
        "wq": xavier(keys[0], (embed_dim, embed_dim)),
        "bq": jax.random.normal(keys[1], (embed_dim,), jnp.float32) * 0.02,
        "wk": xavier(keys[2], (embed_dim, embed_dim)),
        "bk": jax.random.normal(keys[3], (embed_dim,), jnp.float32) * 0.02,
        "wv": xavier(keys[4], (embed_dim, embed_dim)),
        "bv": jax.random.normal(keys[5], (embed_dim,), jnp.float32) * 0.02,
        "wo": xavier(keys[6], (embed_dim, embed_dim)),   # out_proj (xavier, as in _reset_parameters)
        "bo": jnp.zeros((embed_dim,), jnp.float32),       # nn.Linear bias (zero for determinism)
    }

    query = jax.random.normal(keys[7], (T, B, embed_dim), jnp.float32)
    key_in = jax.random.normal(keys[8], (S, B, embed_dim), jnp.float32)
    value = jax.random.normal(keys[9], (S, B, embed_dim), jnp.float32)

    out = multihead_attention(query, key_in, value, params, num_heads)
    out = jax.block_until_ready(out)

    ref = reference(query, key_in, value, params, num_heads)
    assert out.shape == (T, B, embed_dim)
    assert jnp.allclose(out, ref, atol=1e-4, rtol=1e-4), "mismatch vs JAX reference"

    print("KERNEL_OK")
</pallas_src>

<mosaic_0001>
module attributes {stable_mosaic.version = 11 : i64} {
  func.func @_fused_mha_kernel(%arg0: i32, %arg1: memref<8x2x32xf32, #tpu.memory_space<vmem>>, %arg2: memref<8x2x32xf32, #tpu.memory_space<vmem>>, %arg3: memref<8x2x32xf32, #tpu.memory_space<vmem>>, %arg4: memref<4x32x32xf32, #tpu.memory_space<vmem>>, %arg5: memref<4x1x32xf32, #tpu.memory_space<vmem>>, %arg6: memref<8x2x32xf32, #tpu.memory_space<vmem>>) attributes {dimension_semantics = [#tpu.dimension_semantics<arbitrary>], iteration_bounds = array<i64: 1>, scalar_prefetch = 0 : i64, scratch_operands = 0 : i64, tpu.core_type = #tpu.core_type<tc>, window_params = [{pipeline_mode = #tpu.pipeline_mode<synchronous>, transform_indices = @transform_0, window_bounds = array<i64: 8, 2, 32>}, {pipeline_mode = #tpu.pipeline_mode<synchronous>, transform_indices = @transform_1, window_bounds = array<i64: 8, 2, 32>}, {pipeline_mode = #tpu.pipeline_mode<synchronous>, transform_indices = @transform_2, window_bounds = array<i64: 8, 2, 32>}, {pipeline_mode = #tpu.pipeline_mode<synchronous>, transform_indices = @transform_3, window_bounds = array<i64: 4, 32, 32>}, {pipeline_mode = #tpu.pipeline_mode<synchronous>, transform_indices = @transform_4, window_bounds = array<i64: 4, 1, 32>}, {pipeline_mode = #tpu.pipeline_mode<synchronous>, transform_indices = @transform_5, window_bounds = array<i64: 8, 2, 32>}]} {
    %c0 = arith.constant 0 : index
    %c0_0 = arith.constant 0 : index
    %c0_1 = arith.constant 0 : index
    %0 = vector.load %arg1[%c0, %c0_0, %c0_1] : memref<8x2x32xf32, #tpu.memory_space<vmem>>, vector<8x2x32xf32>
    %c0_2 = arith.constant 0 : index
    %c0_3 = arith.constant 0 : index
    %c0_4 = arith.constant 0 : index
    %1 = vector.load %arg2[%c0_2, %c0_3, %c0_4] : memref<8x2x32xf32, #tpu.memory_space<vmem>>, vector<8x2x32xf32>
    %c0_5 = arith.constant 0 : index
    %c0_6 = arith.constant 0 : index
    %c0_7 = arith.constant 0 : index
    %2 = vector.load %arg3[%c0_5, %c0_6, %c0_7] : memref<8x2x32xf32, #tpu.memory_space<vmem>>, vector<8x2x32xf32>
    %c0_8 = arith.constant 0 : index
    %c0_9 = arith.constant 0 : index
    %c0_10 = arith.constant 0 : index
    %3 = vector.load %arg4[%c0_8, %c0_9, %c0_10] : memref<4x32x32xf32, #tpu.memory_space<vmem>>, vector<1x32x32xf32>
    %4 = vector.shape_cast %3 : vector<1x32x32xf32> to vector<32x32xf32>
    %c1 = arith.constant 1 : index
    %c0_11 = arith.constant 0 : index
    %c0_12 = arith.constant 0 : index
    %5 = vector.load %arg4[%c1, %c0_11, %c0_12] : memref<4x32x32xf32, #tpu.memory_space<vmem>>, vector<1x32x32xf32>
    %6 = vector.shape_cast %5 : vector<1x32x32xf32> to vector<32x32xf32>
    %c2 = arith.constant 2 : index
    %c0_13 = arith.constant 0 : index
    %c0_14 = arith.constant 0 : index
    %7 = vector.load %arg4[%c2, %c0_13, %c0_14] : memref<4x32x32xf32, #tpu.memory_space<vmem>>, vector<1x32x32xf32>
    %8 = vector.shape_cast %7 : vector<1x32x32xf32> to vector<32x32xf32>
    %c3 = arith.constant 3 : index
    %c0_15 = arith.constant 0 : index
    %c0_16 = arith.constant 0 : index
    %9 = vector.load %arg4[%c3, %c0_15, %c0_16] : memref<4x32x32xf32, #tpu.memory_space<vmem>>, vector<1x32x32xf32>
    %10 = vector.shape_cast %9 : vector<1x32x32xf32> to vector<32x32xf32>
    %c0_17 = arith.constant 0 : index
    %c0_18 = arith.constant 0 : index
    %c0_19 = arith.constant 0 : index
    %11 = vector.load %arg5[%c0_17, %c0_18, %c0_19] : memref<4x1x32xf32, #tpu.memory_space<vmem>>, vector<1x1x32xf32>
    %12 = vector.shape_cast %11 : vector<1x1x32xf32> to vector<1x32xf32>
    %c1_20 = arith.constant 1 : index
    %c0_21 = arith.constant 0 : index
    %c0_22 = arith.constant 0 : index
    %13 = vector.load %arg5[%c1_20, %c0_21, %c0_22] : memref<4x1x32xf32, #tpu.memory_space<vmem>>, vector<1x1x32xf32>
    %14 = vector.shape_cast %13 : vector<1x1x32xf32> to vector<1x32xf32>
    %c2_23 = arith.constant 2 : index
    %c0_24 = arith.constant 0 : index
    %c0_25 = arith.constant 0 : index
    %15 = vector.load %arg5[%c2_23, %c0_24, %c0_25] : memref<4x1x32xf32, #tpu.memory_space<vmem>>, vector<1x1x32xf32>
    %16 = vector.shape_cast %15 : vector<1x1x32xf32> to vector<1x32xf32>
    %c3_26 = arith.constant 3 : index
    %c0_27 = arith.constant 0 : index
    %c0_28 = arith.constant 0 : index
    %17 = vector.load %arg5[%c3_26, %c0_27, %c0_28] : memref<4x1x32xf32, #tpu.memory_space<vmem>>, vector<1x1x32xf32>
    %18 = vector.shape_cast %17 : vector<1x1x32xf32> to vector<1x32xf32>
    %19 = vector.extract_strided_slice %0 {offsets = [0, 0, 0], sizes = [8, 1, 32], strides = [1, 1, 1]} : vector<8x2x32xf32> to vector<8x1x32xf32>
    %20 = vector.shape_cast %19 : vector<8x1x32xf32> to vector<8x32xf32>
    %cst = arith.constant dense<0.000000e+00> : vector<8x32xf32>
    %21 = tpu.matmul %20, %4, %cst {dimension_numbers = #tpu.dot_dimension_numbers<[1], [0], [0], [1], [0, 0, 1, 1], [], []>} : vector<8x32xf32>, vector<32x32xf32>, vector<8x32xf32> -> vector<8x32xf32>
    %22 = vector.broadcast %12 : vector<1x32xf32> to vector<8x32xf32>
    %23 = arith.addf %21, %22 : vector<8x32xf32>
    %24 = vector.extract_strided_slice %1 {offsets = [0, 0, 0], sizes = [8, 1, 32], strides = [1, 1, 1]} : vector<8x2x32xf32> to vector<8x1x32xf32>
    %25 = vector.shape_cast %24 : vector<8x1x32xf32> to vector<8x32xf32>
    %cst_29 = arith.constant dense<0.000000e+00> : vector<8x32xf32>
    %26 = tpu.matmul %25, %6, %cst_29 {dimension_numbers = #tpu.dot_dimension_numbers<[1], [0], [0], [1], [0, 0, 1, 1], [], []>} : vector<8x32xf32>, vector<32x32xf32>, vector<8x32xf32> -> vector<8x32xf32>
    %27 = vector.broadcast %14 : vector<1x32xf32> to vector<8x32xf32>
    %28 = arith.addf %26, %27 : vector<8x32xf32>
    %29 = vector.extract_strided_slice %2 {offsets = [0, 0, 0], sizes = [8, 1, 32], strides = [1, 1, 1]} : vector<8x2x32xf32> to vector<8x1x32xf32>
    %30 = vector.shape_cast %29 : vector<8x1x32xf32> to vector<8x32xf32>
    %cst_30 = arith.constant dense<0.000000e+00> : vector<8x32xf32>
    %31 = tpu.matmul %30, %8, %cst_30 {dimension_numbers = #tpu.dot_dimension_numbers<[1], [0], [0], [1], [0, 0, 1, 1], [], []>} : vector<8x32xf32>, vector<32x32xf32>, vector<8x32xf32> -> vector<8x32xf32>
    %32 = vector.broadcast %16 : vector<1x32xf32> to vector<8x32xf32>
    %33 = arith.addf %31, %32 : vector<8x32xf32>
    %34 = vector.extract_strided_slice %23 {offsets = [0, 0], sizes = [8, 8], strides = [1, 1]} : vector<8x32xf32> to vector<8x8xf32>
    %35 = vector.extract_strided_slice %28 {offsets = [0, 0], sizes = [8, 8], strides = [1, 1]} : vector<8x32xf32> to vector<8x8xf32>
    %cst_31 = arith.constant dense<0.000000e+00> : vector<8x8xf32>
    %36 = tpu.matmul %34, %35, %cst_31 {dimension_numbers = #tpu.dot_dimension_numbers<[1], [1], [0], [0], [0, 0, 1, 0], [], []>} : vector<8x8xf32>, vector<8x8xf32>, vector<8x8xf32> -> vector<8x8xf32>
    %37 = vector.extract_strided_slice %23 {offsets = [0, 8], sizes = [8, 8], strides = [1, 1]} : vector<8x32xf32> to vector<8x8xf32>
    %38 = vector.extract_strided_slice %28 {offsets = [0, 8], sizes = [8, 8], strides = [1, 1]} : vector<8x32xf32> to vector<8x8xf32>
    %cst_32 = arith.constant dense<0.000000e+00> : vector<8x8xf32>
    %39 = tpu.matmul %37, %38, %cst_32 {dimension_numbers = #tpu.dot_dimension_numbers<[1], [1], [0], [0], [0, 0, 1, 0], [], []>} : vector<8x8xf32>, vector<8x8xf32>, vector<8x8xf32> -> vector<8x8xf32>
    %40 = vector.extract_strided_slice %23 {offsets = [0, 16], sizes = [8, 8], strides = [1, 1]} : vector<8x32xf32> to vector<8x8xf32>
    %41 = vector.extract_strided_slice %28 {offsets = [0, 16], sizes = [8, 8], strides = [1, 1]} : vector<8x32xf32> to vector<8x8xf32>
    %cst_33 = arith.constant dense<0.000000e+00> : vector<8x8xf32>
    %42 = tpu.matmul %40, %41, %cst_33 {dimension_numbers = #tpu.dot_dimension_numbers<[1], [1], [0], [0], [0, 0, 1, 0], [], []>} : vector<8x8xf32>, vector<8x8xf32>, vector<8x8xf32> -> vector<8x8xf32>
    %43 = vector.extract_strided_slice %23 {offsets = [0, 24], sizes = [8, 8], strides = [1, 1]} : vector<8x32xf32> to vector<8x8xf32>
    %44 = vector.extract_strided_slice %28 {offsets = [0, 24], sizes = [8, 8], strides = [1, 1]} : vector<8x32xf32> to vector<8x8xf32>
    %cst_34 = arith.constant dense<0.000000e+00> : vector<8x8xf32>
    %45 = tpu.matmul %43, %44, %cst_34 {dimension_numbers = #tpu.dot_dimension_numbers<[1], [1], [0], [0], [0, 0, 1, 0], [], []>} : vector<8x8xf32>, vector<8x8xf32>, vector<8x8xf32> -> vector<8x8xf32>
    %46 = vector.extract_strided_slice %0 {offsets = [0, 1, 0], sizes = [8, 1, 32], strides = [1, 1, 1]} : vector<8x2x32xf32> to vector<8x1x32xf32>
    %47 = vector.shape_cast %46 : vector<8x1x32xf32> to vector<8x32xf32>
    %cst_35 = arith.constant dense<0.000000e+00> : vector<8x32xf32>
    %48 = tpu.matmul %47, %4, %cst_35 {dimension_numbers = #tpu.dot_dimension_numbers<[1], [0], [0], [1], [0, 0, 1, 1], [], []>} : vector<8x32xf32>, vector<32x32xf32>, vector<8x32xf32> -> vector<8x32xf32>
    %49 = vector.broadcast %12 : vector<1x32xf32> to vector<8x32xf32>
    %50 = arith.addf %48, %49 : vector<8x32xf32>
    %51 = vector.extract_strided_slice %1 {offsets = [0, 1, 0], sizes = [8, 1, 32], strides = [1, 1, 1]} : vector<8x2x32xf32> to vector<8x1x32xf32>
    %52 = vector.shape_cast %51 : vector<8x1x32xf32> to vector<8x32xf32>
    %cst_36 = arith.constant dense<0.000000e+00> : vector<8x32xf32>
    %53 = tpu.matmul %52, %6, %cst_36 {dimension_numbers = #tpu.dot_dimension_numbers<[1], [0], [0], [1], [0, 0, 1, 1], [], []>} : vector<8x32xf32>, vector<32x32xf32>, vector<8x32xf32> -> vector<8x32xf32>
    %54 = vector.broadcast %14 : vector<1x32xf32> to vector<8x32xf32>
    %55 = arith.addf %53, %54 : vector<8x32xf32>
    %56 = vector.extract_strided_slice %2 {offsets = [0, 1, 0], sizes = [8, 1, 32], strides = [1, 1, 1]} : vector<8x2x32xf32> to vector<8x1x32xf32>
    %57 = vector.shape_cast %56 : vector<8x1x32xf32> to vector<8x32xf32>
    %cst_37 = arith.constant dense<0.000000e+00> : vector<8x32xf32>
    %58 = tpu.matmul %57, %8, %cst_37 {dimension_numbers = #tpu.dot_dimension_numbers<[1], [0], [0], [1], [0, 0, 1, 1], [], []>} : vector<8x32xf32>, vector<32x32xf32>, vector<8x32xf32> -> vector<8x32xf32>
    %59 = vector.broadcast %16 : vector<1x32xf32> to vector<8x32xf32>
    %60 = arith.addf %58, %59 : vector<8x32xf32>
    %61 = vector.extract_strided_slice %50 {offsets = [0, 0], sizes = [8, 8], strides = [1, 1]} : vector<8x32xf32> to vector<8x8xf32>
    %62 = vector.extract_strided_slice %55 {offsets = [0, 0], sizes = [8, 8], strides = [1, 1]} : vector<8x32xf32> to vector<8x8xf32>
    %cst_38 = arith.constant dense<0.000000e+00> : vector<8x8xf32>
    %63 = tpu.matmul %61, %62, %cst_38 {dimension_numbers = #tpu.dot_dimension_numbers<[1], [1], [0], [0], [0, 0, 1, 0], [], []>} : vector<8x8xf32>, vector<8x8xf32>, vector<8x8xf32> -> vector<8x8xf32>
    %64 = vector.extract_strided_slice %50 {offsets = [0, 8], sizes = [8, 8], strides = [1, 1]} : vector<8x32xf32> to vector<8x8xf32>
    %65 = vector.extract_strided_slice %55 {offsets = [0, 8], sizes = [8, 8], strides = [1, 1]} : vector<8x32xf32> to vector<8x8xf32>
    %cst_39 = arith.constant dense<0.000000e+00> : vector<8x8xf32>
    %66 = tpu.matmul %64, %65, %cst_39 {dimension_numbers = #tpu.dot_dimension_numbers<[1], [1], [0], [0], [0, 0, 1, 0], [], []>} : vector<8x8xf32>, vector<8x8xf32>, vector<8x8xf32> -> vector<8x8xf32>
    %67 = vector.extract_strided_slice %50 {offsets = [0, 16], sizes = [8, 8], strides = [1, 1]} : vector<8x32xf32> to vector<8x8xf32>
    %68 = vector.extract_strided_slice %55 {offsets = [0, 16], sizes = [8, 8], strides = [1, 1]} : vector<8x32xf32> to vector<8x8xf32>
    %cst_40 = arith.constant dense<0.000000e+00> : vector<8x8xf32>
    %69 = tpu.matmul %67, %68, %cst_40 {dimension_numbers = #tpu.dot_dimension_numbers<[1], [1], [0], [0], [0, 0, 1, 0], [], []>} : vector<8x8xf32>, vector<8x8xf32>, vector<8x8xf32> -> vector<8x8xf32>
    %70 = vector.extract_strided_slice %50 {offsets = [0, 24], sizes = [8, 8], strides = [1, 1]} : vector<8x32xf32> to vector<8x8xf32>
    %71 = vector.extract_strided_slice %55 {offsets = [0, 24], sizes = [8, 8], strides = [1, 1]} : vector<8x32xf32> to vector<8x8xf32>
    %cst_41 = arith.constant dense<0.000000e+00> : vector<8x8xf32>
    %72 = tpu.matmul %70, %71, %cst_41 {dimension_numbers = #tpu.dot_dimension_numbers<[1], [1], [0], [0], [0, 0, 1, 0], [], []>} : vector<8x8xf32>, vector<8x8xf32>, vector<8x8xf32> -> vector<8x8xf32>
    %73 = tpu.concatenate %36, %39, %42, %45, %63, %66, %69, %72 in 0 : vector<8x8xf32>, vector<8x8xf32>, vector<8x8xf32>, vector<8x8xf32>, vector<8x8xf32>, vector<8x8xf32>, vector<8x8xf32>, vector<8x8xf32> -> vector<64x8xf32>
    %cst_42 = arith.constant dense<0xFF800000> : vector<64xf32>
    %74 = vector.multi_reduction <maximumf>, %73, %cst_42 [1] : vector<64x8xf32> to vector<64xf32>
    %75 = vector.shape_cast %74 : vector<64xf32> to vector<64x1xf32>
    %76 = vector.broadcast %75 : vector<64x1xf32> to vector<64x8xf32>
    %77 = arith.subf %73, %76 : vector<64x8xf32>
    %78 = math.exp %77 : vector<64x8xf32>
    %cst_43 = arith.constant dense<0.000000e+00> : vector<64xf32>
    %79 = vector.multi_reduction <add>, %78, %cst_43 [1] : vector<64x8xf32> to vector<64xf32>
    %80 = vector.shape_cast %79 : vector<64xf32> to vector<64x1xf32>
    %81 = tpu.reciprocal %80 : vector<64x1xf32> -> vector<64x1xf32>
    %82 = vector.broadcast %81 : vector<64x1xf32> to vector<64x8xf32>
    %83 = arith.mulf %78, %82 : vector<64x8xf32>
    %cst_44 = arith.constant 0.000000e+00 : f32
    %84 = vector.broadcast %cst_44 : f32 to vector<8x32xf32>
    %85 = vector.extract_strided_slice %83 {offsets = [0, 0], sizes = [8, 8], strides = [1, 1]} : vector<64x8xf32> to vector<8x8xf32>
    %86 = vector.extract_strided_slice %33 {offsets = [0, 0], sizes = [8, 8], strides = [1, 1]} : vector<8x32xf32> to vector<8x8xf32>
    %cst_45 = arith.constant dense<0.000000e+00> : vector<8x8xf32>
    %87 = tpu.matmul %85, %86, %cst_45 {dimension_numbers = #tpu.dot_dimension_numbers<[1], [0], [0], [1], [0, 0, 1, 1], [], []>} : vector<8x8xf32>, vector<8x8xf32>, vector<8x8xf32> -> vector<8x8xf32>
    %88 = vector.extract_strided_slice %10 {offsets = [0, 0], sizes = [8, 32], strides = [1, 1]} : vector<32x32xf32> to vector<8x32xf32>
    %cst_46 = arith.constant dense<0.000000e+00> : vector<8x32xf32>
    %89 = tpu.matmul %87, %88, %cst_46 {dimension_numbers = #tpu.dot_dimension_numbers<[1], [0], [0], [1], [0, 0, 1, 1], [], []>} : vector<8x8xf32>, vector<8x32xf32>, vector<8x32xf32> -> vector<8x32xf32>
    %90 = arith.addf %84, %89 : vector<8x32xf32>
    %91 = vector.extract_strided_slice %83 {offsets = [8, 0], sizes = [8, 8], strides = [1, 1]} : vector<64x8xf32> to vector<8x8xf32>
    %92 = vector.extract_strided_slice %33 {offsets = [0, 8], sizes = [8, 8], strides = [1, 1]} : vector<8x32xf32> to vector<8x8xf32>
    %cst_47 = arith.constant dense<0.000000e+00> : vector<8x8xf32>
    %93 = tpu.matmul %91, %92, %cst_47 {dimension_numbers = #tpu.dot_dimension_numbers<[1], [0], [0], [1], [0, 0, 1, 1], [], []>} : vector<8x8xf32>, vector<8x8xf32>, vector<8x8xf32> -> vector<8x8xf32>
    %94 = vector.extract_strided_slice %10 {offsets = [8, 0], sizes = [8, 32], strides = [1, 1]} : vector<32x32xf32> to vector<8x32xf32>
    %cst_48 = arith.constant dense<0.000000e+00> : vector<8x32xf32>
    %95 = tpu.matmul %93, %94, %cst_48 {dimension_numbers = #tpu.dot_dimension_numbers<[1], [0], [0], [1], [0, 0, 1, 1], [], []>} : vector<8x8xf32>, vector<8x32xf32>, vector<8x32xf32> -> vector<8x32xf32>
    %96 = arith.addf %90, %95 : vector<8x32xf32>
    %97 = vector.extract_strided_slice %83 {offsets = [16, 0], sizes = [8, 8], strides = [1, 1]} : vector<64x8xf32> to vector<8x8xf32>
    %98 = vector.extract_strided_slice %33 {offsets = [0, 16], sizes = [8, 8], strides = [1, 1]} : vector<8x32xf32> to vector<8x8xf32>
    %cst_49 = arith.constant dense<0.000000e+00> : vector<8x8xf32>
    %99 = tpu.matmul %97, %98, %cst_49 {dimension_numbers = #tpu.dot_dimension_numbers<[1], [0], [0], [1], [0, 0, 1, 1], [], []>} : vector<8x8xf32>, vector<8x8xf32>, vector<8x8xf32> -> vector<8x8xf32>
    %100 = vector.extract_strided_slice %10 {offsets = [16, 0], sizes = [8, 32], strides = [1, 1]} : vector<32x32xf32> to vector<8x32xf32>
    %cst_50 = arith.constant dense<0.000000e+00> : vector<8x32xf32>
    %101 = tpu.matmul %99, %100, %cst_50 {dimension_numbers = #tpu.dot_dimension_numbers<[1], [0], [0], [1], [0, 0, 1, 1], [], []>} : vector<8x8xf32>, vector<8x32xf32>, vector<8x32xf32> -> vector<8x32xf32>
    %102 = arith.addf %96, %101 : vector<8x32xf32>
    %103 = vector.extract_strided_slice %83 {offsets = [24, 0], sizes = [8, 8], strides = [1, 1]} : vector<64x8xf32> to vector<8x8xf32>
    %104 = vector.extract_strided_slice %33 {offsets = [0, 24], sizes = [8, 8], strides = [1, 1]} : vector<8x32xf32> to vector<8x8xf32>
    %cst_51 = arith.constant dense<0.000000e+00> : vector<8x8xf32>
    %105 = tpu.matmul %103, %104, %cst_51 {dimension_numbers = #tpu.dot_dimension_numbers<[1], [0], [0], [1], [0, 0, 1, 1], [], []>} : vector<8x8xf32>, vector<8x8xf32>, vector<8x8xf32> -> vector<8x8xf32>
    %106 = vector.extract_strided_slice %10 {offsets = [24, 0], sizes = [8, 32], strides = [1, 1]} : vector<32x32xf32> to vector<8x32xf32>
    %cst_52 = arith.constant dense<0.000000e+00> : vector<8x32xf32>
    %107 = tpu.matmul %105, %106, %cst_52 {dimension_numbers = #tpu.dot_dimension_numbers<[1], [0], [0], [1], [0, 0, 1, 1], [], []>} : vector<8x8xf32>, vector<8x32xf32>, vector<8x32xf32> -> vector<8x32xf32>
    %108 = arith.addf %102, %107 : vector<8x32xf32>
    %109 = vector.broadcast %18 : vector<1x32xf32> to vector<8x32xf32>
    %110 = arith.addf %108, %109 : vector<8x32xf32>
    %cst_53 = arith.constant 0.000000e+00 : f32
    %111 = vector.broadcast %cst_53 : f32 to vector<8x32xf32>
    %112 = vector.extract_strided_slice %83 {offsets = [32, 0], sizes = [8, 8], strides = [1, 1]} : vector<64x8xf32> to vector<8x8xf32>
    %113 = vector.extract_strided_slice %60 {offsets = [0, 0], sizes = [8, 8], strides = [1, 1]} : vector<8x32xf32> to vector<8x8xf32>
    %cst_54 = arith.constant dense<0.000000e+00> : vector<8x8xf32>
    %114 = tpu.matmul %112, %113, %cst_54 {dimension_numbers = #tpu.dot_dimension_numbers<[1], [0], [0], [1], [0, 0, 1, 1], [], []>} : vector<8x8xf32>, vector<8x8xf32>, vector<8x8xf32> -> vector<8x8xf32>
    %115 = vector.extract_strided_slice %10 {offsets = [0, 0], sizes = [8, 32], strides = [1, 1]} : vector<32x32xf32> to vector<8x32xf32>
    %cst_55 = arith.constant dense<0.000000e+00> : vector<8x32xf32>
    %116 = tpu.matmul %114, %115, %cst_55 {dimension_numbers = #tpu.dot_dimension_numbers<[1], [0], [0], [1], [0, 0, 1, 1], [], []>} : vector<8x8xf32>, vector<8x32xf32>, vector<8x32xf32> -> vector<8x32xf32>
    %117 = arith.addf %111, %116 : vector<8x32xf32>
    %118 = vector.extract_strided_slice %83 {offsets = [40, 0], sizes = [8, 8], strides = [1, 1]} : vector<64x8xf32> to vector<8x8xf32>
    %119 = vector.extract_strided_slice %60 {offsets = [0, 8], sizes = [8, 8], strides = [1, 1]} : vector<8x32xf32> to vector<8x8xf32>
    %cst_56 = arith.constant dense<0.000000e+00> : vector<8x8xf32>
    %120 = tpu.matmul %118, %119, %cst_56 {dimension_numbers = #tpu.dot_dimension_numbers<[1], [0], [0], [1], [0, 0, 1, 1], [], []>} : vector<8x8xf32>, vector<8x8xf32>, vector<8x8xf32> -> vector<8x8xf32>
    %121 = vector.extract_strided_slice %10 {offsets = [8, 0], sizes = [8, 32], strides = [1, 1]} : vector<32x32xf32> to vector<8x32xf32>
    %cst_57 = arith.constant dense<0.000000e+00> : vector<8x32xf32>
    %122 = tpu.matmul %120, %121, %cst_57 {dimension_numbers = #tpu.dot_dimension_numbers<[1], [0], [0], [1], [0, 0, 1, 1], [], []>} : vector<8x8xf32>, vector<8x32xf32>, vector<8x32xf32> -> vector<8x32xf32>
    %123 = arith.addf %117, %122 : vector<8x32xf32>
    %124 = vector.extract_strided_slice %83 {offsets = [48, 0], sizes = [8, 8], strides = [1, 1]} : vector<64x8xf32> to vector<8x8xf32>
    %125 = vector.extract_strided_slice %60 {offsets = [0, 16], sizes = [8, 8], strides = [1, 1]} : vector<8x32xf32> to vector<8x8xf32>
    %cst_58 = arith.constant dense<0.000000e+00> : vector<8x8xf32>
    %126 = tpu.matmul %124, %125, %cst_58 {dimension_numbers = #tpu.dot_dimension_numbers<[1], [0], [0], [1], [0, 0, 1, 1], [], []>} : vector<8x8xf32>, vector<8x8xf32>, vector<8x8xf32> -> vector<8x8xf32>
    %127 = vector.extract_strided_slice %10 {offsets = [16, 0], sizes = [8, 32], strides = [1, 1]} : vector<32x32xf32> to vector<8x32xf32>
    %cst_59 = arith.constant dense<0.000000e+00> : vector<8x32xf32>
    %128 = tpu.matmul %126, %127, %cst_59 {dimension_numbers = #tpu.dot_dimension_numbers<[1], [0], [0], [1], [0, 0, 1, 1], [], []>} : vector<8x8xf32>, vector<8x32xf32>, vector<8x32xf32> -> vector<8x32xf32>
    %129 = arith.addf %123, %128 : vector<8x32xf32>
    %130 = vector.extract_strided_slice %83 {offsets = [56, 0], sizes = [8, 8], strides = [1, 1]} : vector<64x8xf32> to vector<8x8xf32>
    %131 = vector.extract_strided_slice %60 {offsets = [0, 24], sizes = [8, 8], strides = [1, 1]} : vector<8x32xf32> to vector<8x8xf32>
    %cst_60 = arith.constant dense<0.000000e+00> : vector<8x8xf32>
    %132 = tpu.matmul %130, %131, %cst_60 {dimension_numbers = #tpu.dot_dimension_numbers<[1], [0], [0], [1], [0, 0, 1, 1], [], []>} : vector<8x8xf32>, vector<8x8xf32>, vector<8x8xf32> -> vector<8x8xf32>
    %133 = vector.extract_strided_slice %10 {offsets = [24, 0], sizes = [8, 32], strides = [1, 1]} : vector<32x32xf32> to vector<8x32xf32>
    %cst_61 = arith.constant dense<0.000000e+00> : vector<8x32xf32>
    %134 = tpu.matmul %132, %133, %cst_61 {dimension_numbers = #tpu.dot_dimension_numbers<[1], [0], [0], [1], [0, 0, 1, 1], [], []>} : vector<8x8xf32>, vector<8x32xf32>, vector<8x32xf32> -> vector<8x32xf32>
    %135 = arith.addf %129, %134 : vector<8x32xf32>
    %136 = vector.broadcast %18 : vector<1x32xf32> to vector<8x32xf32>
    %137 = arith.addf %135, %136 : vector<8x32xf32>
    %138 = vector.shape_cast %110 : vector<8x32xf32> to vector<8x1x32xf32>
    %139 = vector.shape_cast %137 : vector<8x32xf32> to vector<8x1x32xf32>
    %140 = tpu.concatenate %138, %139 in 1 : vector<8x1x32xf32>, vector<8x1x32xf32> -> vector<8x2x32xf32>
    %c0_62 = arith.constant 0 : index
    %c0_63 = arith.constant 0 : index
    %c0_64 = arith.constant 0 : index
    %141 = vector.load %arg6[%c0_62, %c0_63, %c0_64] : memref<8x2x32xf32, #tpu.memory_space<vmem>>, vector<8x2x32xf32>
    tpu.vector_store %arg6[%c0_62, %c0_63, %c0_64], %140 {strides = array<i32>} : memref<8x2x32xf32, #tpu.memory_space<vmem>>, vector<8x2x32xf32>,
    return
  }
  func.func @transform_0(%arg0: i32) -> (i32, i32, i32) {
    %c0_i32 = arith.constant 0 : i32
    %c0_i32_0 = arith.constant 0 : i32
    %c0_i32_1 = arith.constant 0 : i32
    %c0_i32_2 = arith.constant 0 : i32
    return %c0_i32, %c0_i32_0, %c0_i32_1 : i32, i32, i32
  }
  func.func @transform_1(%arg0: i32) -> (i32, i32, i32) {
    %c0_i32 = arith.constant 0 : i32
    %c0_i32_0 = arith.constant 0 : i32
    %c0_i32_1 = arith.constant 0 : i32
    %c0_i32_2 = arith.constant 0 : i32
    return %c0_i32, %c0_i32_0, %c0_i32_1 : i32, i32, i32
  }
  func.func @transform_2(%arg0: i32) -> (i32, i32, i32) {
    %c0_i32 = arith.constant 0 : i32
    %c0_i32_0 = arith.constant 0 : i32
    %c0_i32_1 = arith.constant 0 : i32
    %c0_i32_2 = arith.constant 0 : i32
    return %c0_i32, %c0_i32_0, %c0_i32_1 : i32, i32, i32
  }
  func.func @transform_3(%arg0: i32) -> (i32, i32, i32) {
    %c0_i32 = arith.constant 0 : i32
    %c0_i32_0 = arith.constant 0 : i32
    %c0_i32_1 = arith.constant 0 : i32
    %c0_i32_2 = arith.constant 0 : i32
    return %c0_i32, %c0_i32_0, %c0_i32_1 : i32, i32, i32
  }
  func.func @transform_4(%arg0: i32) -> (i32, i32, i32) {
    %c0_i32 = arith.constant 0 : i32
    %c0_i32_0 = arith.constant 0 : i32
    %c0_i32_1 = arith.constant 0 : i32
    %c0_i32_2 = arith.constant 0 : i32
    return %c0_i32, %c0_i32_0, %c0_i32_1 : i32, i32, i32
  }
  func.func @transform_5(%arg0: i32) -> (i32, i32, i32) {
    %c0_i32 = arith.constant 0 : i32
    %c0_i32_0 = arith.constant 0 : i32
    %c0_i32_1 = arith.constant 0 : i32
    %c0_i32_2 = arith.constant 0 : i32
    return %c0_i32, %c0_i32_0, %c0_i32_1 : i32, i32, i32
  }
}

</mosaic_0001>

<bundles_post_ra>
// kernel: tpu_custom_call.1
= control target key start
LH: loop header
LB: loop body
LE: loop exit
PB: predicated region body
PF: predicated region fallthrough
CT: control target
= control target key end

     0   :  { %10 = vsyncpa [#allocation3], 0  ;;  %s1973_s0 = inlined_call_operand.hbm [shape: f32[8,2,32], index: 0, kind: input, shape index: {}]   ;;  %s1974_s1 = inlined_call_operand.hbm [shape: f32[8,2,32], index: 1, kind: input, shape index: {}]   ;;  %s1975_s2 = inlined_call_operand.hbm [shape: f32[8,2,32], index: 2, kind: input, shape index: {}]   ;;  %s1976_s3 = inlined_call_operand.hbm [shape: f32[4,32,32], index: 3, kind: input, shape index: {}]   ;;  %s1977_s4 = inlined_call_operand.hbm [shape: f32[4,1,32], index: 4, kind: input, shape index: {}]   ;;  %s1978_s5 = inlined_call_operand.hbm [shape: f32[8,2,32], index: 5, kind: output, shape index: {}]  }
   0x1   :  { %11 = vsyncpa [#allocation6], 0 }
   0x2   :  { %12 = vsyncpa [#allocation9], 0 }
   0x3   :  { %13 = vsyncpa [#allocation4], 0  ;;  %s31_s20 = sshll.u32 %s1974_s1, 4  ;;  %s1535_s21 = smov [#allocation5]   ;;  %s32_s20 = int_to_ptr.hbm [resolvable:$true] %s31_s20 }
   0x4   :  { %s33_s22 = sshll.u32 %s1535_s21, 4  ;;  %s57_s25 = sshll.u32 %s1976_s3, 4  ;;  %s34_s22 = int_to_ptr.vmem [resolvable:$true] %s33_s22  ;;  %s58_s25 = int_to_ptr.hbm [resolvable:$true] %s57_s25 }
   0x5   :  { %s1536_s26 = smov 32   ;;  %s1537_s27 = smov 2  }
   0x6   :  { %39 = dma.hbm_to_vmem [thread:$0]  %s32_s20, 256, %s34_s22, [#allocation6], %s1536_s26, %s1536_s26, %s1537_s27  }
   0x7   :  { %s1538_s28 = smov [#allocation8]   ;;  %s1539_s30 = smov 128  }
   0x8   :  { %s59_s29 = sshll.u32 %s1538_s28, 4  ;;  %s1540_s1 = smov 8   ;;  %s60_s29 = int_to_ptr.vmem [resolvable:$true] %s59_s29 }
   0x9   :  { %65 = dma.hbm_to_vmem [thread:$0]  %s58_s25, 2048, %s60_s29, [#allocation9], %s1539_s30, %s1539_s30, %s1540_s1  }
   0xa   :  { %s18_s8 = sshll.u32 %s1973_s0, 4  ;;  %s1541_s9 = smov [#allocation2]   ;;  %s19_s8 = int_to_ptr.hbm [resolvable:$true] %s18_s8 }
   0xb   :  { %s20_s3 = sshll.u32 %s1541_s9, 4  ;;  %s44_s12 = sshll.u32 %s1975_s2, 4  ;;  %s21_s3 = int_to_ptr.vmem [resolvable:$true] %s20_s3  ;;  %s45_s12 = int_to_ptr.hbm [resolvable:$true] %s44_s12 }
   0xc   :  { %26 = dma.hbm_to_vmem [thread:$0]  %s19_s8, 256, %s21_s3, [#allocation3], %s1536_s26, %s1536_s26, %s1537_s27  }
   0xd   :  { %s1542_s13 = smov [#allocation7]   ;;  %s70_s17 = sshll.u32 %s1977_s4, 4  ;;  %s71_s17 = int_to_ptr.hbm [resolvable:$true] %s70_s17 }
   0xe   :  { %s46_s14 = sshll.u32 %s1542_s13, 4  ;;  %s1543_s0 = smov [#allocation10]   ;;  %s47_s14 = int_to_ptr.vmem [resolvable:$true] %s46_s14 }
   0xf   :  { %52 = dma.hbm_to_vmem [thread:$0]  %s45_s12, 256, %s47_s14, [#allocation6], %s1536_s26, %s1536_s26, %s1537_s27  }
  0x10   :  { %s72_s18 = sshll.u32 %s1543_s0, 4  ;;  %s1544_s2 = smov 16   ;;  %s73_s18 = int_to_ptr.vmem [resolvable:$true] %s72_s18 }
  0x11   :  { %s1545_s19 = smov 1  }
  0x12   :  { %78 = dma.hbm_to_vmem [thread:$0]  %s71_s17, 64, %s73_s18, [#allocation9], %s1544_s2, %s1544_s2, %s1545_s19  }
  0x13   :  { %1527 = dma.done.wait [#allocation3], 256  }
  0x14   :  { %1528 = vsyncadd [#allocation3], 4294967040 }
  0x15   :  { %1529 = dma.done.wait [#allocation6], 512  }
  0x16   :  { %1530 = vsyncadd [#allocation6], 4294966784 }
  0x17   :  { %1531 = dma.done.wait [#allocation9], 2112  }
  0x18   :  { %1532 = vsyncadd [#allocation9], 4294965184  ;;  %v1604_v0 = vld [vmem:[#allocation8 + $0x38] sm:$0xff]  ;;  %v1606_v1 = vld [vmem:[#allocation8 + $0x30] sm:$0xff]  ;;  %vm161_vm0 = vcmask 1041409   ;;  %vm164_vm1 = vcmask 1042434  }
  0x19   :  { %v1608_v2 = vld [vmem:[#allocation8 + $0x18] sm:$0xff]  ;;  %243 = vmatpush.msra.mxu1 %v1604_v0  ;;  %v1612_v3 = vld [vmem:[#allocation8 + $0x28] sm:$0xff]  ;;  %v1614_v4 = vld [vmem:[#allocation8 + $0x10] sm:$0xff]  ;;  %vm167_vm2 = vcmask 1043459   ;;  %vm170_vm3 = vcmask 1044484   ;;  %vm173_vm4 = vcmask 1045509  }
  0x1a   :  { %196 = vmatpush.msra.mxu0 %v1608_v2  ;;  %v1616_v5 = vld [vmem:[#allocation8 + $0x20] sm:$0xff]  ;;  %v1618_v6 = vld [vmem:[#allocation8 + $0x8] sm:$0xff]  ;;  %vm176_vm5 = vcmask 1046534   ;;  %vm179_vm6 = vcmask 1047559   ;;  %v1651_v22 = vld [vmem:[#allocation2 + $0x2] sm:$0x3] }
  0x1b   :  { %v1620_v7 = vld [vmem:[#allocation5 + $0x2] sm:$0x3]  ;;  %244 = vmatpush.msra.mxu1 %v1606_v1  ;;  %v1624_v8 = vld [vmem:[#allocation5 + $0x4] sm:$0x3]  ;;  %v1626_v9 = vld [vmem:[#allocation5 + $0x6] sm:$0x3] }
  0x1c   :  { %197 = vmatpush.msra.mxu0 %v1614_v4  ;;  %v1628_v10 = vld [vmem:[#allocation5 + $0x8] sm:$0x3]  ;;  %v1630_v11 = vld [vmem:[#allocation5] sm:$0x3]  ;;  %v1632_v12 = vld [vmem:[#allocation5 + $0xa] sm:$0x3] }
  0x1d   :  { %v1634_v13 = vld [vmem:[#allocation5 + $0xc] sm:$0x3]  ;;  %245 = vmatpush.msra.mxu1 %v1612_v3  ;;  %v1638_v14 = vld [vmem:[#allocation5 + $0xe] sm:$0x3]  ;;  %v215_v15 = vrot.slane %v1620_v7, 7  ;;  %v217_v16 = vrot.slane %v1624_v8, 6 }
  0x1e   :  { %198 = vmatpush.msra.mxu0 %v1618_v6  ;;  %v219_v17 = vrot.slane %v1626_v9, 5  ;;  %v1643_v18 = vld [vmem:[#allocation8] sm:$0xff]  ;;  %v221_v19 = vrot.slane %v1628_v10, 4  ;;  %v223_v21 = vrot.slane %v1632_v12, 3  ;;  %v225_v24 = vrot.slane %v1634_v13, 2  ;;  %s1546_s4 = smov 112  }
  0x1f   :  { %246 = vmatpush.msra.mxu1 %v1616_v5  ;;  %v216_v20 = vsel %vm161_vm0, %v215_v15, %v1630_v11  ;;  %v227_v25 = vrot.slane %v1638_v14, 1  ;;  %v1656_v26 = vld [vmem:[#allocation2] sm:$0x3]  ;;  %v1658_v27 = vld [vmem:[#allocation2 + $0x4] sm:$0x3]  ;;  %vm181_vm7 = vcmask 261120  }
  0x20   :  { %199 = vmatpush.msra.mxu0 %v1643_v18  ;;  %v218_v23 = vsel %vm164_vm1, %v217_v16, %v216_v20  ;;  %v1661_v29 = vld [vmem:[#allocation2 + $0x6] sm:$0x3]  ;;  %v1663_v30 = vld [vmem:[#allocation2 + $0x8] sm:$0x3]  ;;  %v1665_v31 = vld [vmem:[#allocation2 + $0xa] sm:$0x3] }
  0x21   :  { %v220_v28 = vsel %vm167_vm2, %v219_v17, %v218_v23  ;;  %v1668_v33 = vld [vmem:[#allocation2 + $0xc] sm:$0x3]  ;;  %v160_v34 = vrot.slane %v1651_v22, 7  ;;  %v163_v35 = vrot.slane %v1658_v27, 6  ;;  %v1673_v37 = vld [vmem:[#allocation2 + $0xe] sm:$0x3] }
  0x22   :  { %v222_v32 = vsel %vm170_vm3, %v221_v19, %v220_v28  ;;  %v166_v38 = vrot.slane %v1661_v29, 5  ;;  %v169_v39 = vrot.slane %v1663_v30, 4  ;;  %v172_v42 = vrot.slane %v1665_v31, 3  ;;  %v1692_v52 = vld [vmem:[#allocation10 + $0x1] ss:$0 sm:$0xff]  ;;  %s1547_s20 = smov 120  }
  0x23   :  { %v224_v36 = vsel %vm173_vm4, %v223_v21, %v222_v32  ;;  %v162_v41 = vsel %vm161_vm0, %v160_v34, %v1656_v26  ;;  %v175_v45 = vrot.slane %v1668_v33, 2  ;;  %v178_v47 = vrot.slane %v1673_v37, 1  ;;  %v1697_v55 = vld [vmem:[#allocation10] ss:$0 sm:$0xff]  ;;  %v1718_v62 = vld [vmem:[#allocation8 + $0x58] sm:$0xff]  ;;  %v1720_v63 = vld [vmem:[#allocation8 + $0x50] sm:$0xff] }
  0x24   :  { %v226_v40 = vsel %vm176_vm5, %v225_v24, %v224_v36  ;;  %v165_v44 = vsel %vm164_vm1, %v163_v35, %v162_v41  ;;  %vm298_vm8 = vcmask 64512   ;;  %v445_v58 = vrot.slane %v1630_v11, 1  ;;  %290 = vmatpush.msra.mxu2 %v1718_v62  ;;  %v1725_v16 = vld [vmem:[#allocation8 + $0x48] sm:$0xff]  ;;  %v1727_v17 = vld [vmem:[#allocation7 + $0x2] sm:$0x3]  ;;  %v133_v24 = vld [vmem:[#allocation8 + $0x40] sm:$0xff] }
  0x25   :  { %v228_v43 = vsel %vm179_vm6, %v227_v25, %v226_v40  ;;  %v168_v46 = vsel %vm167_vm2, %v166_v38, %v165_v44  ;;  %v447_v59 = vrot.slane %v1624_v8, 7  ;;  %v449_v60 = vrot.slane %v1626_v9, 6  ;;  %v1730_v8 = vld [vmem:[#allocation7 + $0x4] sm:$0x3]  ;;  %v1732_v9 = vld [vmem:[#allocation7 + $0x6] sm:$0x3] }
  0x26   :  { %1295 = vmatmul.msk.f32.vlgmr.msra.gmra.mxu1 %vm181_vm7, %v228_v43  ;;  %v171_v48 = vsel %vm170_vm3, %v169_v39, %v168_v46  ;;  %v451_v61 = vrot.slane %v1628_v10, 5  ;;  %v446_v15 = vsel %vm161_vm0, %v1620_v7, %v445_v58  ;;  %v1734_v10 = vld [vmem:[#allocation7 + $0x8] sm:$0x3]  ;;  %v453_v20 = vrot.slane %v1632_v12, 4  ;;  %291 = vmatpush.msra.mxu2 %v1720_v63  ;;  %v1739_v7 = vld [vmem:[#allocation7] sm:$0x3] }
  0x27   :  { %v174_v49 = vsel %vm173_vm4, %v172_v42, %v171_v48  ;;  %v448_v11 = vsel %vm164_vm1, %v447_v59, %v446_v15  ;;  %v1741_v21 = vld [vmem:[#allocation7 + $0xa] sm:$0x3]  ;;  %v1744_v25 = vld [vmem:[#allocation7 + $0xc] sm:$0x3]  ;;  %v262_v28 = vrot.slane %v1727_v17, 7  ;;  %v264_v32 = vrot.slane %v1730_v8, 6 }
  0x28   :  { %v177_v50 = vsel %vm176_vm5, %v175_v45, %v174_v49  ;;  %v450_v19 = vsel %vm167_vm2, %v449_v60, %v448_v11  ;;  %v266_v34 = vrot.slane %v1732_v9, 5  ;;  %v455_v35 = vrot.slane %v1634_v13, 3  ;;  %292 = vmatpush.msra.mxu2 %v1725_v16  ;;  %v1751_v12 = vld [vmem:[#allocation7 + $0xe] sm:$0x3]  ;;  %s1548_s21 = smov 104   ;;  %s1549_s22 = smov [#allocation11]  }
  0x29   :  { %v180_v51 = vsel %vm179_vm6, %v178_v47, %v177_v50  ;;  %v452_v23 = vsel %vm170_vm3, %v451_v61, %v450_v19  ;;  %v268_v36 = vrot.slane %v1734_v10, 4  ;;  %v457_v38 = vrot.slane %v1638_v14, 2  ;;  %s1277_s23 = sshll.u32 %s1549_s22, 4  ;;  %s1279_s28 = sshll.u32 %s1978_s5, 4  ;;  %s1278_s23 = int_to_ptr.vmem [resolvable:$true] %s1277_s23  ;;  %s1280_s28 = int_to_ptr.hbm [resolvable:$true] %s1279_s28 }
  0x2a   :  { %1294 = vmatmul.msk.f32.vlgmr.msra.gmra.mxu0 %vm181_vm7, %v180_v51  ;;  %v263_v39 = vsel %vm161_vm0, %v262_v28, %v1739_v7  ;;  %v270_v40 = vrot.slane %v1741_v21, 3  ;;  %v409_v41 = vrot.slane %v1656_v26, 1  ;;  %293 = vmatpush.msra.mxu2 %v133_v24  ;;  %v272_v13 = vrot.slane %v1744_v25, 2 }
  0x2b   :  { %v265_v42 = vsel %vm164_vm1, %v264_v32, %v263_v39  ;;  %v274_v44 = vrot.slane %v1751_v12, 1  ;;  %v454_v45 = vsel %vm173_vm4, %v453_v20, %v452_v23  ;;  %v411_v48 = vrot.slane %v1658_v27, 7  ;;  %v1835_v39 = vld [vmem:[#allocation10 + $0x2] ss:$0 sm:$0xff] }
  0x2c   :  { %v267_v43 = vsel %vm167_vm2, %v266_v34, %v265_v42  ;;  %437 = vmatpush.msrb.mxu2 %v1608_v2  ;;  %v456_v46 = vsel %vm176_vm5, %v455_v35, %v454_v45  ;;  %v410_v50 = vsel %vm161_vm0, %v1651_v22, %v409_v41  ;;  %v413_v51 = vrot.slane %v1661_v29, 6 }
  0x2d   :  { %v269_v14 = vsel %vm170_vm3, %v268_v36, %v267_v43  ;;  %v458_v26 = vsel %vm179_vm6, %v457_v38, %v456_v46  ;;  %v417_v27 = vrot.slane %v1665_v31, 4  ;;  %v419_v29 = vrot.slane %v1668_v33, 3 }
  0x2e   :  { %v271_v47 = vsel %vm173_vm4, %v270_v40, %v269_v14  ;;  %438 = vmatpush.msrb.mxu2 %v1614_v4  ;;  %v481_v41 = vrot.slane %v1739_v7, 1  ;;  %v483_v42 = vrot.slane %v1730_v8, 7  ;;  %v487_v43 = vrot.slane %v1734_v10, 5 }
  0x2f   :  { %v273_v49 = vsel %vm176_vm5, %v272_v13, %v271_v47  ;;  %v485_v13 = vrot.slane %v1732_v9, 6  ;;  %v491_v14 = vrot.slane %v1744_v25, 3  ;;  %v493_v47 = vrot.slane %v1751_v12, 2 }
  0x30   :  { %v275_v2 = vsel %vm179_vm6, %v274_v44, %v273_v49  ;;  %439 = vmatpush.msrb.mxu2 %v1618_v6  ;;  %v421_v6 = vrot.slane %v1673_v37, 2  ;;  %v489_v44 = vrot.slane %v1741_v21, 4  ;;  %v482_v45 = vsel %vm161_vm0, %v1727_v17, %v481_v41 }
  0x31   :  { %1296 = vmatmul.msk.f32.vlgmr.msra.gmra.mxu2 %vm181_vm7, %v275_v2  ;;  %v484_v46 = vsel %vm164_vm1, %v483_v42, %v482_v45  ;;  %v140_v45 = vld [vmem:[#allocation8 + $0x70] sm:$0xff] }
  0x32   :  { %440 = vmatpush.msrb.mxu2 %v1643_v18 }
  0xa3   :  { %v248_v53 = vpop.f32.mrf.mxu1 }
  0xa4   :  { %v1695_v54 = vadd.f32 %v1692_v52, %v248_v53  ;;  %v412_v53 = vsel %vm164_vm1, %v411_v48, %v410_v50 }
  0xa5   :  { %v414_v4 = vsel %vm167_vm2, %v413_v51, %v412_v53 }
  0xa6   :  { %355 = vrot.lane.b32.xlu1 %v1695_v54, %s1546_s4  ;;  %327 = vrot.lane.b32.xlu0 %v1695_v54, %s1547_s20 }
  0xa7   :  { %1297 = vmatpush.xpose.msk.msra.mxu3 %vm298_vm8, %v1695_v54  ;;  %v201_v56 = vpop.f32.mrf.mxu0 }
  0xa8   :  { %v1706_v57 = vadd.f32 %v1697_v55, %v201_v56  ;;  %v415_v56 = vrot.slane %v1663_v30, 5 }
  0xaa   :  { %1298 = vmatmul.msk.f32.vlgmr.msra.gmra.mxu3 %vm298_vm8, %v1706_v57  ;;  %v416_v22 = vsel %vm170_vm3, %v415_v56, %v414_v4 }
  0xab   :  { %v418_v58 = vsel %vm173_vm4, %v417_v27, %v416_v22 }
  0xac   :  { %v420_v59 = vsel %vm176_vm5, %v419_v29, %v418_v58 }
  0xad   :  { %v422_v30 = vsel %vm179_vm6, %v421_v6, %v420_v59 }
  0xae   :  { %353 = vrot.lane.b32.xlu1 %v1706_v57, %s1546_s4  ;;  %325 = vrot.lane.b32.xlu0 %v1706_v57, %s1547_s20 }
  0xaf   :  { %1305 = vmatmul.msk.f32.vlgmr.msrb.gmra.mxu2 %vm181_vm7, %v422_v30 }
  0xb4   :  { %v295_v37 = vpop.f32.mrf.mxu2 }
  0xb5   :  { %v1838_v40 = vadd.f32 %v1835_v39, %v295_v37 }
 0x118   :  { %v356_v60 = vpop.permute.xlu1 %355  ;;  %v328_v61 = vpop.permute.xlu0 %327 }
 0x119   :  { %1299 = vmatpush.xpose.msk.msrb.mxu3 %vm298_vm8, %v328_v61  ;;  %1301 = vmatpush.xpose.msk.msrb.mxu0 %vm298_vm8, %v356_v60 }
 0x11d   :  { %473 = vmatpush.msra.mxu3 %v1604_v0  ;;  %509 = vmatpush.msra.mxu0 %v1718_v62 }
 0x11f   :  { %474 = vmatpush.msra.mxu3 %v1606_v1  ;;  %510 = vmatpush.msra.mxu0 %v1720_v63 }
 0x120   :  { %v354_v18 = vpop.permute.xlu1 %353  ;;  %v326_v31 = vpop.permute.xlu0 %325 }
 0x121   :  { %475 = vmatpush.msra.mxu3 %v1612_v3  ;;  %511 = vmatpush.msra.mxu0 %v1725_v16 }
 0x122   :  { %1300 = vmatmul.msk.f32.vlgmr.msrb.gmra.mxu3 %vm298_vm8, %v326_v31  ;;  %1302 = vmatmul.msk.f32.vlgmr.msrb.gmra.mxu0 %vm298_vm8, %v354_v18 }
 0x123   :  { %476 = vmatpush.msra.mxu3 %v1616_v5  ;;  %512 = vmatpush.msra.mxu0 %v133_v24 }
 0x12a   :  { %1306 = vmatmul.msk.f32.vlgmr.msra.gmra.mxu3 %vm181_vm7, %v458_v26  ;;  %v486_v26 = vsel %vm167_vm2, %v485_v13, %v484_v46 }
 0x12b   :  { %v488_v7 = vsel %vm170_vm3, %v487_v43, %v486_v26 }
 0x12c   :  { %v490_v8 = vsel %vm173_vm4, %v489_v44, %v488_v7 }
 0x12d   :  { %v322_v0 = vpop.f32.mrf.mxu3  ;;  %v492_v9 = vsel %vm176_vm5, %v491_v14, %v490_v8 }
 0x12e   :  { %v627_v1 = vsel %vm298_vm8, %v322_v0, -inf  ;;  %v494_v10 = vsel %vm179_vm6, %v493_v47, %v492_v9 }
 0x12f   :  { %628 = vmax.xlane.f32.xlu0 %v627_v1  ;;  %1307 = vmatmul.msk.f32.vlgmr.msra.gmra.mxu0 %vm181_vm7, %v494_v10 }
 0x132   :  { %v442_v15 = vpop.f32.mrf.mxu2 }
 0x133   :  { %v1812_v16 = vadd.f32 %v1697_v55, %v442_v15 }
 0x143   :  { %381 = vrot.lane.b32.xlu0 %v1706_v57, %s1548_s21 }
 0x19f   :  { %v378_v3 = vpop.f32.mrf.mxu0 }
 0x1a0   :  { %v633_v33 = vsel %vm298_vm8, %v378_v3, -inf }
 0x1a1   :  { %634 = vmax.xlane.f32.xlu1 %v633_v33 }
 0x1a2   :  { %v629_v57 = vpop.xlane.xlu0 %628 }
 0x1a3   :  { %v651_v11 = vsub.f32 %v322_v0, %v629_v57 }
 0x1a5   :  { %v1806_v5 = vpop.f32.mrf.mxu3  ;;  %v659_v19 = vmul.f32 1.442695, %v651_v11  ;;  %v1879_v11 = vld [vmem:[#allocation8 + $0x60] sm:$0xff] }
 0x1a6   :  { %v630_v50 = vsel %vm298_vm8, %v1806_v5, -inf }
 0x1a7   :  { %1351 = vpow2.f32 %v659_v19 }
 0x1ad   :  { %v478_v62 = vpop.f32.mrf.mxu3  ;;  %v1817_v20 = vpop.eup %1351 }
 0x1ae   :  { %v479_v63 = vadd.f32 %v1692_v52, %v478_v62  ;;  %v675_v52 = vsel %vm298_vm8, %v1817_v20, 0.0 }
 0x1b0   :  { %573 = vrot.lane.b32.xlu0 %v479_v63, %s1546_s4  ;;  %545 = vrot.lane.b32.xlu2 %v479_v63, %s1547_s20 }
 0x1b5   :  { %v382_v34 = vpop.permute.xlu0 %381 }
 0x1b8   :  { %601 = vrot.lane.b32.xlu0 %v479_v63, %s1548_s21  ;;  %543 = vrot.lane.b32.xlu2 %v1812_v16, %s1547_s20 }
 0x1e1   :  { %676 = vadd.xlane.f32.xlu2 %v675_v52 }
 0x1f9   :  { %383 = vrot.lane.b32.xlu2 %v1695_v54, %s1548_s21 }
 0x201   :  { %571 = vrot.lane.b32.xlu2 %v1812_v16, %s1546_s4 }
 0x209   :  { %599 = vrot.lane.b32.xlu2 %v1812_v16, %s1548_s21 }
 0x20a   :  { %v546_v55 = vpop.permute.xlu2 %545 }
 0x20b   :  { %1310 = vmatpush.xpose.msk.msra.mxu2 %vm298_vm8, %v546_v55 }
 0x212   :  { %v544_v23 = vpop.permute.xlu2 %543 }
 0x213   :  { %1311 = vmatmul.msk.f32.vlgmr.msra.gmra.mxu2 %vm298_vm8, %v544_v23 }
 0x214   :  { %v635_v24 = vpop.xlane.xlu1 %634 }
 0x215   :  { %v653_v28 = vsub.f32 %v378_v3, %v635_v24 }
 0x217   :  { %v663_v32 = vmul.f32 1.442695, %v653_v28 }
 0x219   :  { %1353 = vpow2.f32 %v663_v32 }
 0x21f   :  { %v1829_v35 = vpop.eup %1353 }
 0x220   :  { %v681_v54 = vsel %vm298_vm8, %v1829_v35, 0.0 }
 0x221   :  { %682 = vadd.xlane.f32.xlu1 %v681_v54 }
 0x222   :  { %v574_v36 = vpop.permute.xlu0 %573 }
 0x223   :  { %1312 = vmatpush.xpose.msk.msrb.mxu3 %vm298_vm8, %v574_v36 }
 0x22a   :  { %v602_v38 = vpop.permute.xlu0 %601 }
 0x22b   :  { %1314 = vmatpush.xpose.msk.msrb.mxu0 %vm298_vm8, %v602_v38 }
 0x22f   :  { %910 = vmatpush.msra.mxu0 %v1879_v11 }
 0x23a   :  { %915 = vrot.lane.b32.xlu1 %v1838_v40, %s1546_s4 }
 0x254   :  { %v677_v21 = vpop.xlane.xlu2 %676 }
 0x255   :  { %1355 = vrcp.f32 %v677_v21  ;;  %v710_v53 = vand.u32 2147483648, %v677_v21  ;;  %vm704_vm10 = vweird.f32 %v677_v21  ;;  %v708_v56 = vand.u32 2147483647, %v677_v21 }
 0x257   :  { %v711_v27 = vor.u32 1.1754944e-38, %v710_v53  ;;  %vm709_vm12 = vcmp.eq.f32.partialorder %v708_v56, 8.507059e+37 }
 0x25b   :  { %v1356_v17 = vpop.eup %1355 }
 0x25c   :  { %v700_v25 = vmul.f32 %v1356_v17, %v677_v21  ;;  %v384_v48 = vpop.permute.xlu2 %383  ;;  %vm705_vm9 = vweird.f32 %v1356_v17 }
 0x25d   :  { %1303 = vmatpush.xpose.msk.msrb.mxu1 %vm298_vm8, %v384_v48  ;;  %vm706_vm11 = vmor %vm704_vm10, %vm705_vm9 }
 0x25e   :  { %v701_v12 = vsub.f32 1.0, %v700_v25 }
 0x260   :  { %v702_v49 = vmul.f32 %v1356_v17, %v701_v12  ;;  %1304 = vmatmul.msk.f32.vlgmr.msrb.gmra.mxu1 %vm298_vm8, %v382_v34 }
 0x261   :  { %1308 = vmatpush.xpose.msk.msra.mxu1 %vm298_vm8, %v479_v63 }
 0x262   :  { %v703_v51 = vadd.f32 %v1356_v17, %v702_v49 }
 0x264   :  { %631 = vmax.xlane.f32.xlu1 %v630_v50  ;;  %v572_v2 = vpop.permute.xlu2 %571  ;;  %v707_v4 = vsel %vm706_vm11, %v1356_v17, %v703_v51 }
 0x265   :  { %837 = vmatpush.msrb.mxu1 %v1838_v40  ;;  %1313 = vmatmul.msk.f32.vlgmr.msrb.gmra.mxu3 %vm298_vm8, %v572_v2  ;;  %v712_v22 = vsel %vm709_vm12, %v711_v27, %v707_v4 }
 0x266   :  { %v811_v58 = vmul.f32 %v1817_v20, %v712_v22 }
 0x268   :  { %1309 = vmatmul.msk.f32.vlgmr.msra.gmra.mxu1 %vm298_vm8, %v1812_v16  ;;  %v514_v16 = vpop.f32.mrf.mxu0 }
 0x269   :  { %v1876_v57 = vadd.f32 %v1835_v39, %v514_v16 }
 0x26c   :  { %v600_v29 = vpop.permute.xlu2 %599 }
 0x26d   :  { %1315 = vmatmul.msk.f32.vlgmr.msrb.gmra.mxu0 %vm298_vm8, %v600_v29 }
 0x270   :  { %1316 = vmatmul.msk.f32.vlgmr.msrb.gmra.mxu1 %vm298_vm8, %v811_v58 }
 0x294   :  { %v683_v6 = vpop.xlane.xlu1 %682 }
 0x295   :  { %1357 = vrcp.f32 %v683_v6  ;;  %v738_v1 = vand.u32 2147483648, %v683_v6  ;;  %vm732_vm14 = vweird.f32 %v683_v6  ;;  %v736_v3 = vand.u32 2147483647, %v683_v6 }
 0x296   :  { %v568_v59 = vpop.f32.mrf.mxu2 }
 0x297   :  { %v642_v30 = vsel %vm298_vm8, %v568_v59, -inf  ;;  %v739_v37 = vor.u32 1.1754944e-38, %v738_v1  ;;  %vm737_vm0 = vcmp.eq.f32.partialorder %v736_v3, 8.507059e+37 }
 0x298   :  { %643 = vmax.xlane.f32.xlu0 %v642_v30 }
 0x29b   :  { %v1358_v60 = vpop.eup %1357 }
 0x29c   :  { %v728_v61 = vmul.f32 %v1358_v60, %v683_v6  ;;  %vm733_vm13 = vweird.f32 %v1358_v60 }
 0x29d   :  { %vm734_vm15 = vmor %vm732_vm14, %vm733_vm13 }
 0x29e   :  { %v729_v18 = vsub.f32 1.0, %v728_v61 }
 0x2a0   :  { %v730_v31 = vmul.f32 %v1358_v60, %v729_v18 }
 0x2a2   :  { %v731_v0 = vadd.f32 %v1358_v60, %v730_v31 }
 0x2a4   :  { %v735_v33 = vsel %vm734_vm15, %v1358_v60, %v731_v0 }
 0x2a5   :  { %v740_v62 = vsel %vm737_vm0, %v739_v37, %v735_v33 }
 0x2a6   :  { %v813_v15 = vmul.f32 %v1829_v35, %v740_v62 }
 0x2ac   :  { %v916_v63 = vpop.permute.xlu1 %915  ;;  %843 = vrot.lane.b32.xlu0 %v1838_v40, %s1547_s20 }
 0x2ad   :  { %936 = vmatpush.msra.mxu1 %v916_v63 }
 0x2ae   :  { %1320 = vmatmul.msk.f32.vlgmr.msra.gmra.mxu1 %vm298_vm8, %v813_v15 }
 0x2af   :  { %1037 = vmatpush.msrb.mxu1 %v1876_v57 }
 0x2d7   :  { %v632_v19 = vpop.xlane.xlu1 %631 }
 0x2d8   :  { %v652_v20 = vsub.f32 %v1806_v5, %v632_v19 }
 0x2da   :  { %v661_v52 = vmul.f32 1.442695, %v652_v20 }
 0x2dc   :  { %1359 = vpow2.f32 %v661_v52 }
 0x2dd   :  { %v1883_v55 = vpop.f32.mrf.mxu1 }
 0x2de   :  { %v636_v42 = vsel %vm298_vm8, %v1883_v55, -inf }
 0x2e2   :  { %v1360_v23 = vpop.eup %1359 }
 0x2e3   :  { %v678_v24 = vsel %vm298_vm8, %v1360_v23, 0.0 }
 0x2e4   :  { %679 = vadd.xlane.f32.xlu2 %v678_v24 }
 0x2e5   :  { %v1886_v28 = vpop.f32.mrf.mxu1 }
 0x2e6   :  { %v639_v13 = vsel %vm298_vm8, %v1886_v28, -inf }
 0x2e8   :  { %v1888_v32 = vpop.f32.mrf.mxu3 }
 0x2e9   :  { %v645_v34 = vsel %vm298_vm8, %v1888_v32, -inf }
 0x2ea   :  { %646 = vmax.xlane.f32.xlu0 %v645_v34  ;;  %v1902_v43 = vpop.f32.mrf.mxu0 }
 0x2eb   :  { %v648_v44 = vsel %vm298_vm8, %v1902_v43, -inf }
 0x2ed   :  { %v839_v35 = vpop.f32.mrf.mxu1 }
 0x2ee   :  { %1319 = vmatmul.msk.f32.vlgmr.msra.gmra.mxu0 %vm298_vm8, %v839_v35 }
 0x2fc   :  { %1043 = vrot.lane.b32.xlu2 %v1876_v57, %s1547_s20 }
 0x2fe   :  { %1115 = vrot.lane.b32.xlu0 %v1876_v57, %s1546_s4 }
 0x30b   :  { %v644_v5 = vpop.xlane.xlu0 %643 }
 0x30c   :  { %v656_v54 = vsub.f32 %v568_v59, %v644_v5 }
 0x30e   :  { %v669_v36 = vmul.f32 1.442695, %v656_v54 }
 0x310   :  { %1361 = vpow2.f32 %v669_v36 }
 0x316   :  { %v1362_v38 = vpop.eup %1361 }
 0x317   :  { %v690_v39 = vsel %vm298_vm8, %v1362_v38, 0.0 }
 0x318   :  { %691 = vadd.xlane.f32.xlu1 %v690_v39 }
 0x31e   :  { %v844_v41 = vpop.permute.xlu0 %843 }
 0x31f   :  { %864 = vmatpush.msrb.mxu2 %v844_v41 }
 0x320   :  { %637 = vmax.xlane.f32.xlu1 %v636_v42 }
 0x321   :  { %959 = vmatpush.msra.mxu2 %v140_v45 }
 0x328   :  { %640 = vmax.xlane.f32.xlu1 %v639_v13 }
 0x32b   :  { %v938_v49 = vpop.f32.mrf.mxu1 }
 0x330   :  { %649 = vmax.xlane.f32.xlu1 %v648_v44 }
 0x357   :  { %v680_v14 = vpop.xlane.xlu2 %679 }
 0x358   :  { %1363 = vrcp.f32 %v680_v14  ;;  %v724_v7 = vand.u32 2147483648, %v680_v14  ;;  %v722_v9 = vand.u32 2147483647, %v680_v14  ;;  %vm718_vm2 = vweird.f32 %v680_v14 }
 0x35a   :  { %v725_v21 = vor.u32 1.1754944e-38, %v724_v7  ;;  %vm723_vm4 = vcmp.eq.f32.partialorder %v722_v9, 8.507059e+37 }
 0x35d   :  { %v647_v50 = vpop.xlane.xlu0 %646 }
 0x35e   :  { %v1364_v46 = vpop.eup %1363  ;;  %v657_v16 = vsub.f32 %v1888_v32, %v647_v50  ;;  %v1925_v32 = vld [vmem:[#allocation8 + $0x68] sm:$0xff] }
 0x35f   :  { %v714_v47 = vmul.f32 %v1364_v46, %v680_v14  ;;  %vm719_vm1 = vweird.f32 %v1364_v46  ;;  %v1044_v12 = vpop.permute.xlu2 %1043  ;;  %887 = vmatpush.msra.mxu3 %v1925_v32 }
 0x360   :  { %vm720_vm3 = vmor %vm718_vm2, %vm719_vm1  ;;  %v671_v52 = vmul.f32 1.442695, %v657_v16 }
 0x361   :  { %v715_v26 = vsub.f32 1.0, %v714_v47 }
 0x363   :  { %v716_v8 = vmul.f32 %v1364_v46, %v715_v26 }
 0x365   :  { %v717_v10 = vadd.f32 %v1364_v46, %v716_v8 }
 0x367   :  { %v721_v17 = vsel %vm720_vm3, %v1364_v46, %v717_v10 }
 0x368   :  { %v726_v25 = vsel %vm723_vm4, %v725_v21, %v721_v17 }
 0x369   :  { %v812_v48 = vmul.f32 %v1360_v23, %v726_v25 }
 0x36b   :  { %1317 = vmatmul.msk.f32.vlgmr.msrb.gmra.mxu2 %vm298_vm8, %v812_v48 }
 0x36c   :  { %1064 = vmatpush.msrb.mxu2 %v1044_v12 }
 0x370   :  { %v1116_v51 = vpop.permute.xlu0 %1115 }
 0x371   :  { %1136 = vmatpush.msra.mxu1 %v1116_v51 }
 0x373   :  { %1321 = vmatmul.msk.f32.vlgmr.msra.gmra.mxu2 %vm298_vm8, %v938_v49 }
 0x374   :  { %1159 = vmatpush.msra.mxu2 %v140_v45 }
 0x38b   :  { %v692_v2 = vpop.xlane.xlu1 %691 }
 0x38c   :  { %1365 = vrcp.f32 %v692_v2  ;;  %v780_v29 = vand.u32 2147483648, %v692_v2  ;;  %v778_v59 = vand.u32 2147483647, %v692_v2  ;;  %vm774_vm6 = vweird.f32 %v692_v2 }
 0x38e   :  { %v781_v60 = vor.u32 1.1754944e-38, %v780_v29  ;;  %vm779_vm9 = vcmp.eq.f32.partialorder %v778_v59, 8.507059e+37 }
 0x392   :  { %v1366_v53 = vpop.eup %1365 }
 0x393   :  { %v770_v56 = vmul.f32 %v1366_v53, %v692_v2  ;;  %v638_v4 = vpop.xlane.xlu1 %637  ;;  %vm775_vm5 = vweird.f32 %v1366_v53 }
 0x394   :  { %v654_v27 = vsub.f32 %v1883_v55, %v638_v4  ;;  %vm776_vm7 = vmor %vm774_vm6, %vm775_vm5 }
 0x395   :  { %v771_v22 = vsub.f32 1.0, %v770_v56 }
 0x396   :  { %v665_v58 = vmul.f32 1.442695, %v654_v27 }
 0x397   :  { %v772_v6 = vmul.f32 %v1366_v53, %v771_v22 }
 0x398   :  { %1367 = vpow2.f32 %v665_v58 }
 0x399   :  { %v773_v30 = vadd.f32 %v1366_v53, %v772_v6 }
 0x39b   :  { %v777_v61 = vsel %vm776_vm7, %v1366_v53, %v773_v30  ;;  %v641_v18 = vpop.xlane.xlu1 %640 }
 0x39c   :  { %v782_v31 = vsel %vm779_vm9, %v781_v60, %v777_v61  ;;  %v655_v0 = vsub.f32 %v1886_v28, %v641_v18 }
 0x39d   :  { %v816_v1 = vmul.f32 %v1362_v38, %v782_v31 }
 0x39e   :  { %v1910_v3 = vpop.eup %1367  ;;  %v667_v33 = vmul.f32 1.442695, %v655_v0 }
 0x39f   :  { %1325 = vmatmul.msk.f32.vlgmr.msrb.gmra.mxu2 %vm298_vm8, %v816_v1  ;;  %v684_v37 = vsel %vm298_vm8, %v1910_v3, 0.0 }
 0x3a0   :  { %1369 = vpow2.f32 %v667_v33  ;;  %685 = vadd.xlane.f32.xlu2 %v684_v37 }
 0x3a3   :  { %v650_v62 = vpop.xlane.xlu1 %649 }
 0x3a4   :  { %v658_v63 = vsub.f32 %v1902_v43, %v650_v62 }
 0x3a6   :  { %v1370_v15 = vpop.eup %1369  ;;  %v673_v19 = vmul.f32 1.442695, %v658_v63 }
 0x3a7   :  { %v687_v20 = vsel %vm298_vm8, %v1370_v15, 0.0 }
 0x3a8   :  { %1371 = vpow2.f32 %v673_v19  ;;  %688 = vadd.xlane.f32.xlu1 %v687_v20 }
 0x3a9   :  { %1373 = vpow2.f32 %v671_v52 }
 0x3ae   :  { %v1918_v55 = vpop.eup %1371 }
 0x3af   :  { %v696_v23 = vsel %vm298_vm8, %v1918_v55, 0.0  ;;  %v1374_v24 = vpop.eup %1373 }
 0x3b0   :  { %697 = vadd.xlane.f32.xlu1 %v696_v23  ;;  %v693_v28 = vsel %vm298_vm8, %v1374_v24, 0.0 }
 0x3b8   :  { %1165 = vrot.lane.b32.xlu2 %v1876_v57, %s1548_s21  ;;  %694 = vadd.xlane.f32.xlu1 %v693_v28 }
 0x3d1   :  { %965 = vrot.lane.b32.xlu1 %v1838_v40, %s1548_s21 }
 0x3ee   :  { %v866_v34 = vpop.f32.mrf.mxu2 }
 0x3ef   :  { %1318 = vmatmul.msk.f32.vlgmr.msra.gmra.mxu3 %vm298_vm8, %v866_v34 }
 0x3f6   :  { %v961_v60 = vpop.f32.mrf.mxu2 }
 0x413   :  { %v686_v5 = vpop.xlane.xlu2 %685 }
 0x414   :  { %v752_v50 = vand.u32 2147483648, %v686_v5  ;;  %vm746_vm2 = vweird.f32 %v686_v5  ;;  %v750_v2 = vand.u32 2147483647, %v686_v5 }
 0x416   :  { %v753_v29 = vor.u32 1.1754944e-38, %v752_v50  ;;  %vm751_vm5 = vcmp.eq.f32.partialorder %v750_v2, 8.507059e+37 }
 0x41b   :  { %v689_v35 = vpop.xlane.xlu1 %688  ;;  %v1166_v18 = vpop.permute.xlu2 %1165 }
 0x41c   :  { %1375 = vrcp.f32 %v689_v35  ;;  %v766_v39 = vand.u32 2147483648, %v689_v35  ;;  %v764_v42 = vand.u32 2147483647, %v689_v35  ;;  %vm760_vm11 = vweird.f32 %v689_v35 }
 0x41d   :  { %1377 = vrcp.f32 %v686_v5 }
 0x41e   :  { %v767_v40 = vor.u32 1.1754944e-38, %v766_v39  ;;  %vm765_vm13 = vcmp.eq.f32.partialorder %v764_v42, 8.507059e+37 }
 0x422   :  { %v1376_v54 = vpop.eup %1375  ;;  %v1066_v33 = vpop.f32.mrf.mxu2 }
 0x423   :  { %v756_v36 = vmul.f32 %v1376_v54, %v689_v35  ;;  %v1931_v38 = vpop.xlane.xlu1 %697  ;;  %vm761_vm10 = vweird.f32 %v1376_v54  ;;  %v1378_v43 = vpop.eup %1377 }
 0x424   :  { %vm762_vm12 = vmor %vm760_vm11, %vm761_vm10  ;;  %v742_v46 = vmul.f32 %v1378_v43, %v686_v5  ;;  %vm747_vm15 = vweird.f32 %v1378_v43  ;;  %v808_v0 = vand.u32 2147483648, %v1931_v38  ;;  %vm802_vm7 = vweird.f32 %v1931_v38 }
 0x425   :  { %v757_v57 = vsub.f32 1.0, %v756_v36  ;;  %vm748_vm4 = vmor %vm746_vm2, %vm747_vm15  ;;  %v806_v1 = vand.u32 2147483647, %v1931_v38  ;;  %vm1255_vm11 = vcmask 1040384  }
 0x426   :  { %v743_v26 = vsub.f32 1.0, %v742_v46  ;;  %v809_v37 = vor.u32 1.1754944e-38, %v808_v0 }
 0x427   :  { %v758_v41 = vmul.f32 %v1376_v54, %v757_v57  ;;  %vm807_vm10 = vcmp.eq.f32.partialorder %v806_v1, 8.507059e+37 }
 0x428   :  { %v744_v9 = vmul.f32 %v1378_v43, %v743_v26 }
 0x429   :  { %v759_v13 = vadd.f32 %v1376_v54, %v758_v41 }
 0x42a   :  { %v745_v48 = vadd.f32 %v1378_v43, %v744_v9 }
 0x42b   :  { %v763_v44 = vsel %vm762_vm12, %v1376_v54, %v759_v13  ;;  %v695_v45 = vpop.xlane.xlu1 %694  ;;  %v1350_v54 = vld [vmem:[#allocation10 + $0x3] ss:$0 sm:$0xff]  ;;  %vm1264_vm12 = vcmask 254976  }
 0x42c   :  { %v768_v14 = vsel %vm765_vm13, %v767_v40, %v763_v44  ;;  %1379 = vrcp.f32 %v695_v45  ;;  %v794_v21 = vand.u32 2147483648, %v695_v45  ;;  %v792_v25 = vand.u32 2147483647, %v695_v45 }
 0x42d   :  { %v815_v47 = vmul.f32 %v1370_v15, %v768_v14  ;;  %1381 = vrcp.f32 %v1931_v38  ;;  %vm788_vm0 = vweird.f32 %v695_v45  ;;  %v749_v4 = vsel %vm748_vm4, %v1378_v43, %v745_v48  ;;  %v141_v15 = vld [vmem:[#allocation8 + $0x78] sm:$0xff] }
 0x42e   :  { %v795_v51 = vor.u32 1.1754944e-38, %v794_v21  ;;  %vm793_vm3 = vcmp.eq.f32.partialorder %v792_v25, 8.507059e+37  ;;  %v754_v58 = vsel %vm751_vm5, %v753_v29, %v749_v4  ;;  %1009 = vmatpush.msrb.mxu0 %v141_v15 }
 0x42f   :  { %1324 = vmatmul.msk.f32.vlgmr.msrb.gmra.mxu1 %vm298_vm8, %v815_v47  ;;  %v814_v30 = vmul.f32 %v1910_v3, %v754_v58 }
 0x430   :  { %1110 = vmatpush.msra.mxu0 %v1879_v11 }
 0x432   :  { %v1380_v7 = vpop.eup %1379 }
 0x433   :  { %v784_v8 = vmul.f32 %v1380_v7, %v695_v45  ;;  %vm789_vm14 = vweird.f32 %v1380_v7  ;;  %v1382_v49 = vpop.eup %1381 }
 0x434   :  { %vm790_vm1 = vmor %vm788_vm0, %vm789_vm14  ;;  %v798_v27 = vmul.f32 %v1382_v49, %v1931_v38  ;;  %vm803_vm6 = vweird.f32 %v1382_v49 }
 0x435   :  { %v785_v10 = vsub.f32 1.0, %v784_v8  ;;  %vm804_vm9 = vmor %vm802_vm7, %vm803_vm6 }
 0x436   :  { %v799_v6 = vsub.f32 1.0, %v798_v27 }
 0x437   :  { %v786_v17 = vmul.f32 %v1380_v7, %v785_v10 }
 0x438   :  { %v800_v61 = vmul.f32 %v1382_v49, %v799_v6 }
 0x439   :  { %v787_v12 = vadd.f32 %v1380_v7, %v786_v17 }
 0x43a   :  { %v801_v31 = vadd.f32 %v1382_v49, %v800_v61 }
 0x43b   :  { %v791_v53 = vsel %vm790_vm1, %v1380_v7, %v787_v12 }
 0x43c   :  { %v796_v56 = vsel %vm793_vm3, %v795_v51, %v791_v53  ;;  %v805_v3 = vsel %vm804_vm9, %v1382_v49, %v801_v31 }
 0x43d   :  { %v817_v22 = vmul.f32 %v1374_v24, %v796_v56  ;;  %v810_v62 = vsel %vm807_vm10, %v809_v37, %v805_v3 }
 0x43e   :  { %v818_v63 = vmul.f32 %v1918_v55, %v810_v62  ;;  %v912_v55 = vpop.f32.mrf.mxu0 }
 0x43f   :  { %1328 = vmatmul.msk.f32.vlgmr.msra.gmra.mxu1 %vm298_vm8, %v817_v22 }
 0x443   :  { %v966_v59 = vpop.permute.xlu1 %965 }
 0x444   :  { %986 = vmatpush.msrb.mxu3 %v966_v59 }
 0x445   :  { %1322 = vmatmul.msk.f32.vlgmr.msrb.gmra.mxu3 %vm298_vm8, %v814_v30 }
 0x446   :  { %1087 = vmatpush.msra.mxu3 %v1925_v32 }
 0x448   :  { %1186 = vmatpush.msrb.mxu3 %v1166_v18 }
 0x44d   :  { %1326 = vmatmul.msk.f32.vlgmr.msra.gmra.mxu3 %vm298_vm8, %v1066_v33 }
 0x455   :  { %1330 = vmatmul.msk.f32.vlgmr.msrb.gmra.mxu3 %vm298_vm8, %v818_v63 }
 0x472   :  { %v889_v20 = vpop.f32.mrf.mxu3 }
 0x473   :  { %v913_v32 = vadd.f32 %v912_v55, %v889_v20 }
 0x475   :  { %v964_v11 = vadd.f32 %v961_v60, %v913_v32 }
 0x4ac   :  { %v1039_v16 = vpop.f32.mrf.mxu1 }
 0x4bc   :  { %v1138_v19 = vpop.f32.mrf.mxu1 }
 0x4bd   :  { %1329 = vmatmul.msk.f32.vlgmr.msra.gmra.mxu2 %vm298_vm8, %v1138_v19 }
 0x4c8   :  { %v988_v52 = vpop.f32.mrf.mxu3 }
 0x4c9   :  { %1323 = vmatmul.msk.f32.vlgmr.msrb.gmra.mxu0 %vm298_vm8, %v988_v52 }
 0x4ca   :  { %1209 = vmatpush.msrb.mxu0 %v141_v15 }
 0x4d0   :  { %v1089_v23 = vpop.f32.mrf.mxu3 }
 0x4d1   :  { %1327 = vmatmul.msk.f32.vlgmr.msra.gmra.mxu0 %vm298_vm8, %v1039_v16 }
 0x4d8   :  { %v1188_v24 = vpop.f32.mrf.mxu3 }
 0x4d9   :  { %1331 = vmatmul.msk.f32.vlgmr.msrb.gmra.mxu0 %vm298_vm8, %v1188_v24 }
 0x540   :  { %v1161_v36 = vpop.f32.mrf.mxu2 }
 0x546   :  { %v1011_v28 = vpop.f32.mrf.mxu0 }
 0x547   :  { %v1014_v5 = vadd.f32 %v1011_v28, %v964_v11 }
 0x549   :  { %v1018_v57 = vadd.f32 %v1350_v54, %v1014_v5 }
 0x54b   :  { %v1217_v13 = vrot.slane %v1018_v57, 1  ;;  %v1218_v43 = vrot.slane %v1018_v57, 2  ;;  %v1219_v40 = vrot.slane %v1018_v57, 3  ;;  %v1220_v44 = vrot.slane %v1018_v57, 4 }
 0x54c   :  { %v1221_v48 = vrot.slane %v1018_v57, 5  ;;  %v1222_v4 = vrot.slane %v1018_v57, 6  ;;  %v1223_v22 = vrot.slane %v1018_v57, 7 }
 0x54e   :  { %v1112_v34 = vpop.f32.mrf.mxu0 }
 0x54f   :  { %v1113_v35 = vadd.f32 %v1112_v34, %v1089_v23 }
 0x551   :  { %v1164_v38 = vadd.f32 %v1161_v36, %v1113_v35 }
 0x556   :  { %v1211_v39 = vpop.f32.mrf.mxu0 }
 0x557   :  { %v1214_v41 = vadd.f32 %v1211_v39, %v1164_v38 }
 0x559   :  { %v1215_v42 = vadd.f32 %v1350_v54, %v1214_v41 }
 0x55b   :  { %v1232_v45 = vrot.slane %v1215_v42, 1  ;;  %v1233_v14 = vrot.slane %v1215_v42, 2  ;;  %v1234_v46 = vrot.slane %v1215_v42, 3  ;;  %v1235_v47 = vrot.slane %v1215_v42, 4 }
 0x55c   :  { %v1236_v26 = vrot.slane %v1215_v42, 5  ;;  %v1237_v7 = vrot.slane %v1215_v42, 6  ;;  %v1238_v8 = vrot.slane %v1215_v42, 7  ;;  %v1239_v9 = vperm.slane %v1215_v42, 0 }
 0x55d   :  { %v1240_v10 = vperm.slane %v1232_v45, 0  ;;  %v1241_v21 = vperm.slane %v1233_v14, 0  ;;  %v1242_v17 = vperm.slane %v1234_v46, 0  ;;  %v1243_v25 = vperm.slane %v1235_v47, 0 }
 0x55e   :  { %v1244_v12 = vperm.slane %v1236_v26, 0  ;;  %v1245_v49 = vperm.slane %v1237_v7, 0  ;;  %v1256_v50 = vsel %vm1255_vm11, %v1018_v57, %v1239_v9  ;;  %v1246_v51 = vperm.slane %v1238_v8, 0 }
 0x55f   :  { %v1257_v2 = vsel %vm1255_vm11, %v1217_v13, %v1240_v10  ;;  %v1258_v53 = vsel %vm1255_vm11, %v1218_v43, %v1241_v21  ;;  %v1259_v56 = vsel %vm1255_vm11, %v1219_v40, %v1242_v17  ;;  %1265 = vst.msk [vmem:[#allocation11] sm:$0x3] %vm1264_vm12, %v1256_v50  ;;  %v1260_v27 = vsel %vm1255_vm11, %v1220_v44, %v1243_v25 }
 0x560   :  { %1266 = vst.msk [vmem:[#allocation11 + $0x2] sm:$0x3] %vm1264_vm12, %v1257_v2  ;;  %v1261_v29 = vsel %vm1255_vm11, %v1221_v48, %v1244_v12  ;;  %v1262_v58 = vsel %vm1255_vm11, %v1222_v4, %v1245_v49  ;;  %v1263_v6 = vsel %vm1255_vm11, %v1223_v22, %v1246_v51 }
 0x561   :  { %1267 = vst.msk [vmem:[#allocation11 + $0x4] sm:$0x3] %vm1264_vm12, %v1258_v53 }
 0x562   :  { %1268 = vst.msk [vmem:[#allocation11 + $0x6] sm:$0x3] %vm1264_vm12, %v1259_v56 }
 0x563   :  { %1269 = vst.msk [vmem:[#allocation11 + $0x8] sm:$0x3] %vm1264_vm12, %v1260_v27 }
 0x564   :  { %1270 = vst.msk [vmem:[#allocation11 + $0xa] sm:$0x3] %vm1264_vm12, %v1261_v29 }
 0x565   :  { %1271 = vst.msk [vmem:[#allocation11 + $0xc] sm:$0x3] %vm1264_vm12, %v1262_v58 }
 0x566   :  { %1272 = vst.msk [vmem:[#allocation11 + $0xe] sm:$0x3] %vm1264_vm12, %v1263_v6 }
 0x567   :  { %1285 = dma.vmem_to_hbm [thread:$0]  %s1278_s23, 256, %s1280_s28, [#allocation4], %s1536_s26, %s1536_s26, %s1537_s27  }
 0x568   :  { %1533 = dma.done.wait [#allocation4], 256  }
 0x569   :  { %1534 = vsyncadd [#allocation4], 4294967040 }
 0x56a   :  { %1290 = vsyncpa [#allocation3], 1 }
 0x56b   :  { %1291 = vsyncpa [#allocation6], 1 }
 0x56c   :  { %1292 = vsyncpa [#allocation9], 1 }
 0x56d   :  { %1293 = vsyncpa [#allocation4], 1 }

</bundles_post_ra>
